<compile_context>
chip_gen: v5e
topology: v5e:2x2
jax: 0.10.0
libtpu: 0.0.40
codegen_flags: <defaults>
</compile_context>

<pallas_src>
import jax
import jax.numpy as jnp
from jax.experimental import pallas as pl
from jax.experimental.pallas import tpu as pltpu


def identity_kernel(x_ref, o_ref):
    # The entire "forward" of Net: return x unchanged.
    o_ref[...] = x_ref[...]


_MAX_LANES = 8192              # max column width (lanes) for the lane-dense layout
_TARGET_BLOCK_BYTES = 4 << 20  # ~4 MiB blocks: long DMAs, double-buffers fine on v7x
_VMEM_LIMIT_BYTES = 32 << 20   # 2 bufs x (in+out) x 4 MiB + headroom; valid on all chips


def _lane_dense_cols(n):
    """Largest multiple-of-128 divisor of n that is <= _MAX_LANES (0 if none)."""
    best = 0
    c = 128
    lim = min(n, _MAX_LANES)
    while c <= lim:
        if n % c == 0:
            best = c
        c += 128
    return best


def _net_forward_impl(x):
    orig_shape = x.shape
    n = x.size
    itemsize = jnp.dtype(x.dtype).itemsize

    cost = pl.CostEstimate(flops=0, transcendentals=0,
                           bytes_accessed=2 * n * itemsize)

    C = _lane_dense_cols(n)
    if C > 0:
        # Lane-dense layout: full-row blocks -> contiguous HBM strides and
        # unmasked full-width stores. 1-D grid over rows ("parallel" so v7x
        # can shard it across its 2 TensorCores; no-op on v5e/v6e).
        R = n // C
        x2d = x.reshape(R, C)
        tr_target = max(1, _TARGET_BLOCK_BYTES // (C * itemsize))
        if tr_target >= R:
            tr = R                              # full extent: always legal
        else:
            tr = max(8, (tr_target // 8) * 8)   # (8, *)-aligned sublane tile
        grid = (pl.cdiv(R, tr),)
        in_spec = pl.BlockSpec((tr, C), lambda i: (i, 0))
        out_spec = pl.BlockSpec((tr, C), lambda i: (i, 0))
    else:
        # Fallback for sizes not divisible by 128: single row, tile along lanes.
        # Block (1, tc): sublane dim is full extent, lane dim is either full
        # extent or a multiple of 128 (partial last block is masked by Pallas).
        x2d = x.reshape(1, n)
        max_cols = max(128, ((_TARGET_BLOCK_BYTES // itemsize) // 128) * 128)
        tc = n if n <= max_cols else max_cols
        grid = (pl.cdiv(n, tc),)
        in_spec = pl.BlockSpec((1, tc), lambda j: (0, j))
        out_spec = pl.BlockSpec((1, tc), lambda j: (0, j))

    out2d = pl.pallas_call(
        identity_kernel,
        out_shape=jax.ShapeDtypeStruct(x2d.shape, x2d.dtype),
        grid_spec=pltpu.PrefetchScalarGridSpec(
            num_scalar_prefetch=0,
            grid=grid,
            in_specs=[in_spec],
            out_specs=out_spec,
        ),
        compiler_params=pltpu.CompilerParams(
            dimension_semantics=("parallel",),
            vmem_limit_bytes=_VMEM_LIMIT_BYTES,
        ),
        cost_estimate=cost,
        input_output_aliases={0: 0},
    )(x2d)

    return out2d.reshape(orig_shape)


# Jit the wrapper so the reshape is a layout no-op and the aliased pallas_call
# input is an intermediate buffer (the caller's `x` is never invalidated).
net_forward = jax.jit(_net_forward_impl)


if __name__ == "__main__":
    key = jax.random.PRNGKey(0)
    # Small NCHW-shaped input consistent with a typical conv-net entry point.
    x = jax.random.normal(key, (2, 4, 16, 16), dtype=jnp.float32)

    y = net_forward(x)
    jax.block_until_ready(y)

    assert y.shape == x.shape and y.dtype == x.dtype
    assert bool(jnp.all(y == x))
    print("KERNEL_OK")
</pallas_src>

<mosaic_0001>
module attributes {stable_mosaic.version = 11 : i64} {
  func.func @identity_kernel(%arg0: i32, %arg1: memref<1x2048xf32, #tpu.memory_space<vmem>>, %arg2: memref<1x2048xf32, #tpu.memory_space<vmem>>) attributes {dimension_semantics = [#tpu.dimension_semantics<parallel>], iteration_bounds = array<i64: 1>, scalar_prefetch = 0 : i64, scratch_operands = 0 : i64, tpu.core_type = #tpu.core_type<tc>, window_params = [{transform_indices = @transform_0, window_bounds = array<i64: 1, 2048>}, {transform_indices = @transform_1, window_bounds = array<i64: 1, 2048>}]} {
    %c0 = arith.constant 0 : index
    %c0_0 = arith.constant 0 : index
    %0 = vector.load %arg1[%c0, %c0_0] : memref<1x2048xf32, #tpu.memory_space<vmem>>, vector<1x2048xf32>
    %c0_1 = arith.constant 0 : index
    %c0_2 = arith.constant 0 : index
    %1 = vector.load %arg2[%c0_1, %c0_2] : memref<1x2048xf32, #tpu.memory_space<vmem>>, vector<1x2048xf32>
    tpu.vector_store %arg2[%c0_1, %c0_2], %0 {strides = array<i32>} : memref<1x2048xf32, #tpu.memory_space<vmem>>, vector<1x2048xf32>,
    return
  }
  func.func @transform_0(%arg0: i32) -> (i32, i32) {
    %c0_i32 = arith.constant 0 : i32
    %c0_i32_0 = arith.constant 0 : i32
    return %arg0, %c0_i32 : i32, i32
  }
  func.func @transform_1(%arg0: i32) -> (i32, i32) {
    %c0_i32 = arith.constant 0 : i32
    %c0_i32_0 = arith.constant 0 : i32
    return %arg0, %c0_i32 : i32, i32
  }
}

</mosaic_0001>

<bundles_post_ra>
// kernel: _net_forward_impl.1
= control target key start
LH: loop header
LB: loop body
LE: loop exit
PB: predicated region body
PF: predicated region fallthrough
CT: control target
= control target key end

     0   :  { %s38_s0 = inlined_call_operand.vmem [shape: f32[1,2048], index: 0, kind: input, shape index: {}, may-alias: {0,1}]   ;;  %s39_s1 = inlined_call_operand.vmem [shape: f32[1,2048], index: 1, kind: output, shape index: {}, may-alias: {0,1}]  }
   0x1   :  { %v8_v0 = vld [vmem:[%s38_s0] sm:$0xff]  ;;  %v9_v1 = vld [vmem:[%s38_s0 + $0x8] sm:$0xff] }
   0x2   :  { %10 = vst [vmem:[%s39_s1] sm:$0xff] %v8_v0 }
   0x3   :  { %11 = vst [vmem:[%s39_s1 + $0x8] sm:$0xff] %v9_v1 }

</bundles_post_ra>
